<compile_context>
chip_gen: v5e
topology: v5e:2x2
jax: 0.10.0
libtpu: 0.0.40
codegen_flags: <defaults>
</compile_context>

<pallas_src>
import functools

import jax
import jax.numpy as jnp
from jax.experimental import pallas as pl
from jax.experimental.pallas import tpu as pltpu

_ELEMENTWISE = ("sigmoid", "relu", "tanh", "identity")
_WIDTH_CANDIDATES = (2048, 1024, 512, 256, 128)   # lane-dense widths (x128)
MIN_GRID_STEPS = 8                                 # only enforced on 2-TC chips


def _round_up(x: int, m: int) -> int:
    return ((x + m - 1) // m) * m


def _chip_traits() -> dict:
    """Generation-aware knobs: TC count, tile byte budget, VMEM cap, bf16 math."""
    kind = ""
    try:
        kind = jax.devices()[0].device_kind.lower()
    except Exception:
        pass
    if "v5" in kind:   # v5e: 1 TC, 128 MiB VMEM, no bf16 VPU/EUP
        return dict(num_tcs=1, tile_bytes=8 << 20, vmem_cap=64 << 20, bf16_math=False)
    if "v6" in kind:   # v6e: 1 TC, 128 MiB VMEM, bf16 VPU/EUP
        return dict(num_tcs=1, tile_bytes=8 << 20, vmem_cap=64 << 20, bf16_math=True)
    if "v7" in kind or "7x" in kind:  # v7x: 2 TCs, 64 MiB VMEM per TC
        return dict(num_tcs=2, tile_bytes=4 << 20, vmem_cap=30 << 20, bf16_math=True)
    # Unknown generation: conservative (small VMEM, assume 2 TCs, f32 math).
    return dict(num_tcs=2, tile_bytes=4 << 20, vmem_cap=30 << 20, bf16_math=False)


def _xla_activation(x: jax.Array, activation: str) -> jax.Array:
    """Plain-XLA fallback for ragged tails / sub-vreg tensors."""
    if activation == "sigmoid":
        return jax.nn.sigmoid(x.astype(jnp.float32)).astype(x.dtype)
    if activation == "relu":
        return jnp.maximum(x, 0)
    if activation == "tanh":
        return jnp.tanh(x.astype(jnp.float32)).astype(x.dtype)
    return x


def _activation_kernel(x_ref, o_ref, *, activation: str, compute_dtype):
    x = x_ref[...]
    if activation == "relu":
        # Native dtype: no casts, pure VALU max -> minimal vreg pressure.
        o_ref[...] = jnp.maximum(x, 0)
        return
    x = x.astype(compute_dtype)
    if activation == "sigmoid":
        # tanh form: one EUP push + two VALU ops per element (no full-precision
        # divide), so the single EUP slot never binds at v7x's 3.2 TB/s roofline.
        y = 0.5 * (jnp.tanh(0.5 * x) + 1.0)
    elif activation == "tanh":
        y = jnp.tanh(x)
    else:  # identity (unreachable: wrapper early-returns)
        y = x
    o_ref[...] = y.astype(o_ref.dtype)


def _run_2d(x2d: jax.Array, activation: str, traits: dict, donate: bool) -> jax.Array:
    rows, width = x2d.shape
    dtype = x2d.dtype
    itemsize = jnp.dtype(dtype).itemsize
    n = rows * width

    # Sublane granularity for packed dtypes: (8,128) f32, (16,128) bf16, (32,128) 8-bit.
    sub = {4: 8, 2: 16, 1: 32}.get(itemsize, 8)

    # Tile rows from the per-generation byte budget; keep >= MIN_GRID_STEPS
    # steps only on multi-TC chips so both cores get work via "parallel".
    row_tile = max(sub, (traits["tile_bytes"] // (width * itemsize)) // sub * sub)
    if traits["num_tcs"] > 1:
        row_tile = min(row_tile, max(sub, _round_up(pl.cdiv(rows, MIN_GRID_STEPS), sub)))
    if row_tile >= rows:
        row_tile = rows  # full-extent block shape is always legal
    grid = (pl.cdiv(rows, row_tile),)

    tile_bytes = row_tile * width * itemsize
    # in + out, double-buffered, plus headroom; capped per generation.
    vmem_limit = min(max(4 * tile_bytes + (4 << 20), 16 << 20), traits["vmem_cap"])

    # Compute dtype: stay native for f32, and for bf16 on chips with bf16
    # VPU/EUP (v6e/v7x); upcast to f32 otherwise (v5e, fp16, unknown).
    if activation in ("sigmoid", "tanh"):
        if dtype == jnp.float32 or (dtype == jnp.bfloat16 and traits["bf16_math"]):
            compute_dtype = dtype
        else:
            compute_dtype = jnp.float32
        transcendentals = n
    else:
        compute_dtype = dtype
        transcendentals = 0

    kernel = functools.partial(
        _activation_kernel, activation=activation, compute_dtype=compute_dtype)

    return pl.pallas_call(
        kernel,
        out_shape=jax.ShapeDtypeStruct((rows, width), dtype),
        grid_spec=pltpu.PrefetchScalarGridSpec(
            num_scalar_prefetch=0,
            grid=grid,
            in_specs=[pl.BlockSpec((row_tile, width), lambda i: (i, 0))],
            out_specs=pl.BlockSpec((row_tile, width), lambda i: (i, 0)),
        ),
        compiler_params=pltpu.CompilerParams(
            dimension_semantics=("parallel",),
            vmem_limit_bytes=vmem_limit,
        ),
        cost_estimate=pl.CostEstimate(
            flops=n,
            transcendentals=transcendentals,
            bytes_accessed=2 * n * itemsize,
        ),
        # Aliasing halves peak HBM footprint but only pays off when the caller
        # can actually donate the buffer (e.g. inside a jit with donated args).
        input_output_aliases={0: 0} if donate else {},
    )(x2d)


def predictor(logits: jax.Array, activation: str = "sigmoid",
              donate_input: bool = False) -> jax.Array:
    """Applies `activation` elementwise to `logits` via a Pallas TPU kernel.

    Matches `Predictor.forward(logits) = activation_fn(logits)` (same shape,
    dtype, values) for elementwise activations.
    """
    if activation not in _ELEMENTWISE:
        # TODO(synk): channel-wise softmax needs the channel dim in-tile; it is
        # not wired into this elementwise kernel -- fail loudly.
        raise NotImplementedError(f"activation {activation!r} not supported")

    if activation == "identity":
        return logits                      # zero HBM traffic
    if logits.size == 0:
        return logits                      # empty-input guard

    if activation in ("sigmoid", "tanh") and not jnp.issubdtype(
            logits.dtype, jnp.floating):
        raise TypeError(f"{activation} requires a floating dtype, got {logits.dtype}")

    orig_shape = logits.shape
    n = logits.size
    traits = _chip_traits()
    flat = logits.reshape(-1)

    # Pick the widest lane-dense slab width that divides n: no pad / slice
    # copies on the hot path and long unmasked 128-lane vector stores.
    width = next((w for w in _WIDTH_CANDIDATES if n % w == 0), None)
    if width is not None:
        rows = n // width
        out2d = _run_2d(flat.reshape(rows, width), activation, traits, donate_input)
        return out2d.reshape(orig_shape)

    # Ragged element count (rare for CRAFT score maps): run the kernel on the
    # aligned prefix and the <width tail with plain XLA -- cheaper than a
    # full pad copy of the input plus a slice copy of the output.
    width = 512
    n_main = (n // width) * width
    if n_main == 0:
        # Sub-vreg tensor: a grid launch costs more than the op itself.
        return _xla_activation(flat, activation).reshape(orig_shape)
    main = _run_2d(flat[:n_main].reshape(n_main // width, width),
                   activation, traits, donate=False)
    tail = _xla_activation(flat[n_main:], activation)
    return jnp.concatenate([main.reshape(-1), tail]).reshape(orig_shape)


if __name__ == "__main__":
    # CRAFT-style score-map logits: NCHW with region / affinity channels.
    key = jax.random.PRNGKey(0)
    x = jax.random.normal(key, (2, 4, 16, 16), dtype=jnp.float32)

    # Sigmoid (the CRAFT default).
    y = jax.block_until_ready(predictor(x, activation="sigmoid"))
    ref = jax.nn.sigmoid(x)
    assert y.shape == x.shape and y.dtype == x.dtype
    assert jnp.allclose(y, ref, atol=2e-6, rtol=2e-6)

    # ReLU path (native-dtype, cast-free kernel branch).
    yr = jax.block_until_ready(predictor(x, activation="relu"))
    assert jnp.allclose(yr, jnp.maximum(x, 0.0), atol=0, rtol=0)

    # Identity fast path.
    yi = predictor(x, activation="identity")
    assert yi is x

    print("KERNEL_OK")
</pallas_src>

<mosaic_0001>
module attributes {stable_mosaic.version = 11 : i64} {
  func.func @_activation_kernel(%arg0: i32, %arg1: memref<1x2048xf32, #tpu.memory_space<vmem>>, %arg2: memref<1x2048xf32, #tpu.memory_space<vmem>>) attributes {dimension_semantics = [#tpu.dimension_semantics<parallel>], iteration_bounds = array<i64: 1>, scalar_prefetch = 0 : i64, scratch_operands = 0 : i64, tpu.core_type = #tpu.core_type<tc>, window_params = [{transform_indices = @transform_0, window_bounds = array<i64: 1, 2048>}, {transform_indices = @transform_1, window_bounds = array<i64: 1, 2048>}]} {
    %c0 = arith.constant 0 : index
    %c0_0 = arith.constant 0 : index
    %0 = vector.load %arg1[%c0, %c0_0] : memref<1x2048xf32, #tpu.memory_space<vmem>>, vector<1x2048xf32>
    %cst = arith.constant 5.000000e-01 : f32
    %1 = vector.broadcast %cst : f32 to vector<1x2048xf32>
    %2 = arith.mulf %1, %0 : vector<1x2048xf32>
    %3 = math.tanh %2 : vector<1x2048xf32>
    %cst_1 = arith.constant 1.000000e+00 : f32
    %4 = vector.broadcast %cst_1 : f32 to vector<1x2048xf32>
    %5 = arith.addf %3, %4 : vector<1x2048xf32>
    %cst_2 = arith.constant 5.000000e-01 : f32
    %6 = vector.broadcast %cst_2 : f32 to vector<1x2048xf32>
    %7 = arith.mulf %6, %5 : vector<1x2048xf32>
    %c0_3 = arith.constant 0 : index
    %c0_4 = arith.constant 0 : index
    %8 = vector.load %arg2[%c0_3, %c0_4] : memref<1x2048xf32, #tpu.memory_space<vmem>>, vector<1x2048xf32>
    tpu.vector_store %arg2[%c0_3, %c0_4], %7 {strides = array<i32>} : memref<1x2048xf32, #tpu.memory_space<vmem>>, vector<1x2048xf32>,
    return
  }
  func.func @transform_0(%arg0: i32) -> (i32, i32) {
    %c0_i32 = arith.constant 0 : i32
    %c0_i32_0 = arith.constant 0 : i32
    return %arg0, %c0_i32 : i32, i32
  }
  func.func @transform_1(%arg0: i32) -> (i32, i32) {
    %c0_i32 = arith.constant 0 : i32
    %c0_i32_0 = arith.constant 0 : i32
    return %arg0, %c0_i32 : i32, i32
  }
}

</mosaic_0001>

<bundles_post_ra>
// kernel: tpu_custom_call.1
= control target key start
LH: loop header
LB: loop body
LE: loop exit
PB: predicated region body
PF: predicated region fallthrough
CT: control target
= control target key end

     0   :  { %6 = vsyncpa [#allocation3], 0  ;;  %s128_s0 = inlined_call_operand.hbm [shape: f32[1,2048], index: 0, kind: input, shape index: {}]   ;;  %s129_s1 = inlined_call_operand.hbm [shape: f32[1,2048], index: 1, kind: output, shape index: {}]  }
   0x1   :  { %7 = vsyncpa [#allocation4], 0  ;;  %s13_s8 = sshll.u32 %s128_s0, 4  ;;  %s110_s9 = smov [#allocation2]   ;;  %s14_s8 = int_to_ptr.hbm [resolvable:$true] %s13_s8 }
   0x2   :  { %s15_s10 = sshll.u32 %s110_s9, 4  ;;  %s16_s10 = int_to_ptr.vmem [resolvable:$true] %s15_s10 }
   0x3   :  { %18 = dma.hbm_to_vmem [thread:$0]  %s14_s8, 256, %s16_s10, [#allocation3]  }
   0x4   :  { %106 = dma.done.wait [#allocation3], 256  }
   0x5   :  { %107 = vsyncadd [#allocation3], 4294967040  ;;  %v23_v0 = vld [vmem:[#allocation2] sm:$0xff]  ;;  %v24_v1 = vld [vmem:[#allocation2 + $0x8] sm:$0xff]  ;;  %s111_s11 = smov [#allocation5]   ;;  %s42_s14 = sshll.u32 %s129_s1, 4  ;;  %s43_s14 = int_to_ptr.hbm [resolvable:$true] %s42_s14 }
   0x6   :  { %v25_v2 = vmul.f32 0.5, %v23_v0  ;;  %v26_v3 = vmul.f32 0.5, %v24_v1  ;;  %s40_s12 = sshll.u32 %s111_s11, 4  ;;  %s41_s12 = int_to_ptr.vmem [resolvable:$true] %s40_s12 }
   0x8   :  { %54 = vtanh.f32 %v25_v2 }
   0x9   :  { %56 = vtanh.f32 %v26_v3 }
   0xe   :  { %v55_v4 = vpop.eup %54 }
   0xf   :  { %v57_v5 = vpop.eup %56  ;;  %v29_v6 = vadd.f32 1.0, %v55_v4 }
  0x10   :  { %v30_v7 = vadd.f32 1.0, %v57_v5 }
  0x11   :  { %v31_v8 = vmul.f32 0.5, %v29_v6 }
  0x12   :  { %v32_v9 = vmul.f32 0.5, %v30_v7 }
  0x13   :  { %33 = vst [vmem:[#allocation5] sm:$0xff] %v31_v8 }
  0x14   :  { %34 = vst [vmem:[#allocation5 + $0x8] sm:$0xff] %v32_v9 }
  0x15   :  { %45 = dma.vmem_to_hbm [thread:$0]  %s41_s12, 256, %s43_s14, [#allocation4]  }
  0x16   :  { %108 = dma.done.wait [#allocation4], 256  }
  0x17   :  { %109 = vsyncadd [#allocation4], 4294967040 }
  0x18   :  { %50 = vsyncpa [#allocation3], 1 }
  0x19   :  { %51 = vsyncpa [#allocation4], 1 }

</bundles_post_ra>
